<compile_context>
chip_gen: v7x
topology: tpu7x:2x2x1
jax: 0.10.0
libtpu: 0.0.40
codegen_flags: <defaults>
</compile_context>

<pallas_src>
import numpy as np
import jax
import jax.numpy as jnp
from jax.experimental import pallas as pl
from jax.experimental.pallas import tpu as pltpu  # noqa: F401

SUB = 8     # f32 sublane granule (second-minor dim)
LANE = 128  # lane granule (enforced only on the output / W2 columns -> lane-dense store)


def _ceil_to(x, m):
    return ((x + m - 1) // m) * m


def gcn_kernel(a_ref, x_ref, w1_ref, b1_ref, w2_ref, b2_ref, o_ref):
    """Whole GCN forward on small VMEM-resident operands.

    a_ref : (Np, Np)  normalized adjacency (zero-padded rows/cols >= N)
    x_ref : (Np, Fp)  node features
    w1_ref: (Fp, Hp), b1_ref: (1, Hp)   layer-1 params
    w2_ref: (Hp, Op), b2_ref: (1, Op)   layer-2 params (Op = F_out padded to 128)
    o_ref : (Np, Op)  output; valid region is [:N, :F_out]
    """
    a = a_ref[...]  # one vreg at these sizes; cheap to keep live across both layers
    # Layer 1: transform first (narrow contraction), then aggregate over nodes.
    xw1 = jnp.dot(x_ref[...], w1_ref[...], preferred_element_type=jnp.float32)
    h = jnp.maximum(
        jnp.dot(a, xw1, preferred_element_type=jnp.float32) + b1_ref[...], 0.0
    )
    # NOTE(padding): rows >= N of h hold ReLU(b1); they are nulled in the second
    # aggregation because A's padded *columns* are zero, so [:N] stays exact.
    hw2 = jnp.dot(h, w2_ref[...], preferred_element_type=jnp.float32)
    o_ref[...] = jnp.dot(a, hw2, preferred_element_type=jnp.float32) + b2_ref[...]


def _pad_to(x, rows, cols):
    x = jnp.asarray(x, jnp.float32)
    return jnp.pad(x, ((0, rows - x.shape[0]), (0, cols - x.shape[1])))


def gcn_norm_dense(edge_index, edge_attr, num_nodes):
    """Dense D^-1/2 (A + I) D^-1/2 from a COO edge list (fused into the same jit)."""
    row, col = edge_index[0], edge_index[1]            # edge j: row[j] -> col[j]
    A = jnp.zeros((num_nodes, num_nodes), jnp.float32)
    A = A.at[col, row].add(edge_attr)                  # A[target, source] = weight ('add' aggr)
    diag = jnp.arange(num_nodes)
    A = A.at[diag, diag].add(1.0)                      # self loops, weight 1
    deg = A.sum(axis=1)
    dinv = jnp.where(deg > 0, jax.lax.rsqrt(deg), 0.0)
    return dinv[:, None] * A * dinv[None, :]


@jax.jit
def gcn_forward(x, edge_index, edge_attr, w1, b1, w2, b2):
    n, f_in = x.shape
    hidden = w1.shape[1]
    f_out = w2.shape[1]

    np_ = _ceil_to(n, SUB)        # node dim -> multiple of 8
    fp = _ceil_to(f_in, SUB)      # input-feature dim -> multiple of 8
    hp = _ceil_to(hidden, SUB)    # hidden dim -> multiple of 8
    op = _ceil_to(f_out, LANE)    # output dim -> multiple of 128 (lane-dense out slab)

    a_p = _pad_to(gcn_norm_dense(edge_index, edge_attr, n), np_, np_)
    x_p = _pad_to(x, np_, fp)
    w1_p = _pad_to(w1, fp, hp)
    b1_p = _pad_to(b1.reshape(1, -1), 1, hp)
    w2_p = _pad_to(w2, hp, op)
    b2_p = _pad_to(b2.reshape(1, -1), 1, op)

    spec = lambda r, c: pl.BlockSpec((r, c), lambda: (0, 0))
    out_p = pl.pallas_call(
        gcn_kernel,
        out_shape=jax.ShapeDtypeStruct((np_, op), jnp.float32),
        in_specs=[
            spec(np_, np_),   # A
            spec(np_, fp),    # X
            spec(fp, hp),     # W1
            spec(1, hp),      # b1
            spec(hp, op),     # W2
            spec(1, op),      # b2
        ],
        out_specs=spec(np_, op),
    )(a_p, x_p, w1_p, b1_p, w2_p, b2_p)
    # TODO(synk): for many graphs, batch them along a leading grid axis
    # (grid=(num_graphs,), dimension_semantics=("parallel",)) to amortize launch overhead.
    return out_p[:n, :f_out]


def gcn_reference(x, edge_index, edge_attr, w1, b1, w2, b2):
    a = gcn_norm_dense(edge_index, edge_attr, x.shape[0])
    h = jnp.maximum(a @ (x @ w1) + b1, 0.0)
    return a @ (h @ w2) + b2


def glorot(key, shape):
    limit = float(np.sqrt(6.0 / (shape[0] + shape[1])))
    return jax.random.uniform(key, shape, jnp.float32, -limit, limit)


if __name__ == "__main__":
    key = jax.random.PRNGKey(0)
    k_x, k_w1, k_w2, k_e = jax.random.split(key, 4)

    N, F_IN, HIDDEN, F_OUT = 8, 4, 32, 1

    # Deterministic node features and a bidirectional ring graph.
    x = jax.random.normal(k_x, (N, F_IN), jnp.float32)
    src = jnp.arange(N, dtype=jnp.int32)
    dst = (src + 1) % N
    edge_index = jnp.stack(
        [jnp.concatenate([src, dst]), jnp.concatenate([dst, src])], axis=0
    )  # shape (2, 2N)
    edge_attr = jax.random.uniform(k_e, (2 * N,), jnp.float32, 0.5, 1.5)

    # GCNConv parameters (glorot weights, zero bias), deterministic.
    w1 = glorot(k_w1, (F_IN, HIDDEN))
    b1 = jnp.zeros((HIDDEN,), jnp.float32)
    w2 = glorot(k_w2, (HIDDEN, F_OUT))
    b2 = jnp.zeros((F_OUT,), jnp.float32)

    out = gcn_forward(x, edge_index, edge_attr, w1, b1, w2, b2)
    out = jax.block_until_ready(out)

    ref = gcn_reference(x, edge_index, edge_attr, w1, b1, w2, b2)
    np.testing.assert_allclose(np.asarray(out), np.asarray(ref), rtol=1e-5, atol=1e-5)
    assert out.shape == (N, F_OUT)
    print("KERNEL_OK")
</pallas_src>

<mosaic_0001>
module attributes {stable_mosaic.version = 11 : i64} {
  func.func private @main(%arg0: i32) attributes {dimension_semantics = [#tpu.dimension_semantics<core_parallel>], iteration_bounds = array<i64: 2>, tpu.core_type = #tpu.core_type<sc_scalar_subcore>, window_params = []} {
    return
  }
}

module attributes {stable_mosaic.version = 11 : i64} {
  func.func private @main(%arg0: i32) attributes {dimension_semantics = [#tpu.dimension_semantics<core_parallel>], iteration_bounds = array<i64: 2>, tpu.core_type = #tpu.core_type<sc_scalar_subcore>, window_params = []} {
    return
  }
}

module attributes {stable_mosaic.version = 11 : i64} {
  func.func @gcn_kernel(%arg0: memref<8x8xf32, #tpu.memory_space<vmem>>, %arg1: memref<8x8xf32, #tpu.memory_space<vmem>>, %arg2: memref<8x32xf32, #tpu.memory_space<vmem>>, %arg3: memref<1x32xf32, #tpu.memory_space<vmem>>, %arg4: memref<32x128xf32, #tpu.memory_space<vmem>>, %arg5: memref<1x128xf32, #tpu.memory_space<vmem>>, %arg6: memref<8x128xf32, #tpu.memory_space<vmem>>) attributes {dimension_semantics = [], scalar_prefetch = 0 : i64, scratch_operands = 0 : i64, tpu.core_type = #tpu.core_type<tc>} {
    %c0 = arith.constant 0 : index
    %c0_0 = arith.constant 0 : index
    %0 = vector.load %arg0[%c0, %c0_0] : memref<8x8xf32, #tpu.memory_space<vmem>>, vector<8x8xf32>
    %c0_1 = arith.constant 0 : index
    %c0_2 = arith.constant 0 : index
    %1 = vector.load %arg1[%c0_1, %c0_2] : memref<8x8xf32, #tpu.memory_space<vmem>>, vector<8x8xf32>
    %c0_3 = arith.constant 0 : index
    %c0_4 = arith.constant 0 : index
    %2 = vector.load %arg2[%c0_3, %c0_4] : memref<8x32xf32, #tpu.memory_space<vmem>>, vector<8x32xf32>
    %cst = arith.constant dense<0.000000e+00> : vector<8x32xf32>
    %3 = tpu.matmul %1, %2, %cst {dimension_numbers = #tpu.dot_dimension_numbers<[1], [0], [0], [1], [0, 0, 1, 1], [], []>} : vector<8x8xf32>, vector<8x32xf32>, vector<8x32xf32> -> vector<8x32xf32>
    %cst_5 = arith.constant dense<0.000000e+00> : vector<8x32xf32>
    %4 = tpu.matmul %0, %3, %cst_5 {dimension_numbers = #tpu.dot_dimension_numbers<[1], [0], [0], [1], [0, 0, 1, 1], [], []>} : vector<8x8xf32>, vector<8x32xf32>, vector<8x32xf32> -> vector<8x32xf32>
    %c0_6 = arith.constant 0 : index
    %c0_7 = arith.constant 0 : index
    %5 = vector.load %arg3[%c0_6, %c0_7] : memref<1x32xf32, #tpu.memory_space<vmem>>, vector<1x32xf32>
    %6 = vector.broadcast %5 : vector<1x32xf32> to vector<8x32xf32>
    %7 = arith.addf %4, %6 : vector<8x32xf32>
    %cst_8 = arith.constant 0.000000e+00 : f32
    %8 = vector.broadcast %cst_8 : f32 to vector<8x32xf32>
    %9 = arith.maximumf %7, %8 : vector<8x32xf32>
    %c0_9 = arith.constant 0 : index
    %c0_10 = arith.constant 0 : index
    %10 = vector.load %arg4[%c0_9, %c0_10] : memref<32x128xf32, #tpu.memory_space<vmem>>, vector<32x128xf32>
    %cst_11 = arith.constant dense<0.000000e+00> : vector<8x128xf32>
    %11 = tpu.matmul %9, %10, %cst_11 {dimension_numbers = #tpu.dot_dimension_numbers<[1], [0], [0], [1], [0, 0, 1, 1], [], []>} : vector<8x32xf32>, vector<32x128xf32>, vector<8x128xf32> -> vector<8x128xf32>
    %cst_12 = arith.constant dense<0.000000e+00> : vector<8x128xf32>
    %12 = tpu.matmul %0, %11, %cst_12 {dimension_numbers = #tpu.dot_dimension_numbers<[1], [0], [0], [1], [0, 0, 1, 1], [], []>} : vector<8x8xf32>, vector<8x128xf32>, vector<8x128xf32> -> vector<8x128xf32>
    %c0_13 = arith.constant 0 : index
    %c0_14 = arith.constant 0 : index
    %13 = vector.load %arg5[%c0_13, %c0_14] : memref<1x128xf32, #tpu.memory_space<vmem>>, vector<1x128xf32>
    %14 = vector.broadcast %13 : vector<1x128xf32> to vector<8x128xf32>
    %15 = arith.addf %12, %14 : vector<8x128xf32>
    %c0_15 = arith.constant 0 : index
    %c0_16 = arith.constant 0 : index
    %16 = vector.load %arg6[%c0_15, %c0_16] : memref<8x128xf32, #tpu.memory_space<vmem>>, vector<8x128xf32>
    tpu.vector_store %arg6[%c0_15, %c0_16], %15 {strides = array<i32>} : memref<8x128xf32, #tpu.memory_space<vmem>>, vector<8x128xf32>,
    return
  }
}

</mosaic_0001>

<bundles_post_ra>
// kernel: gcn_forward.1
= control target key start
LH: loop header
LB: loop body
LE: loop exit
PB: predicated region body
PF: predicated region fallthrough
CT: control target
= control target key end

     0   :  { %vm26_vm0 = vcmask 64512   ;;  %v393_v0 = vmov 0.0   ;;  %vm394_vm1 = vmmov 0   ;;  %v395_v3 = vmov 0.0|0.0   ;;  %s468_s2 = inlined_call_operand.vmem [shape: f32[8,32], index: 2, kind: input, shape index: {}]   ;;  %s469_s1 = inlined_call_operand.vmem [shape: f32[8,8], index: 1, kind: input, shape index: {}]   ;;  %s470_s4 = inlined_call_operand.vmem [shape: f32[32,128], index: 4, kind: input, shape index: {}]   ;;  %s471_s0 = inlined_call_operand.vmem [shape: f32[8,8], index: 0, kind: input, shape index: {}]   ;;  %s472_s3 = inlined_call_operand.vmem [shape: f32[1,32], index: 3, kind: input, shape index: {}]   ;;  %s473_s5 = inlined_call_operand.vmem [shape: f32[1,128], index: 5, kind: input, shape index: {}]   ;;  %s474_s6 = inlined_call_operand.vmem [shape: f32[8,128], index: 6, kind: output, shape index: {}]  }
   0x1   :  { %358 = vmatprep.subr.mxu0 %v393_v0  ;;  %v25_v1 = vld [vmem:[%s468_s2] sm:$0xff]  ;;  %360 = vmatprep.mubr.msk.f32.mxu0 %vm394_vm1, %v393_v0  ;;  %v182_v5 = vld [vmem:[%s470_s4 + $0x8] sm:$0xff]  ;;  %v183_v10 = vld [vmem:[%s470_s4 + $0x10] sm:$0xff]  ;;  %vm185_vm2 = vcmask 261120  }
   0x2   :  { %v24_v2 = vld [vmem:[%s469_s1] sm:$0xff]  ;;  %359 = vmatpush3.msra.mxu0 %v25_v1  ;;  %363 = vmatprep.subr.mxu1 %v393_v0  ;;  %v184_v11 = vld [vmem:[%s470_s4 + $0x18] sm:$0xff] }
   0x3   :  { %361 = vmatmul.mubr.msk.f32.vlgmr.msra.gmra.mrb[0].mxu0 %vm26_vm0, %v24_v2  ;;  %365 = vmatprep.mubr.msk.f32.mxu1 %vm394_vm1, %v393_v0  ;;  %v181_v4 = vld [vmem:[%s470_s4] sm:$0xff]  ;;  %v388_v12 = vpack.c.bf16 %v184_v11, %v183_v10 }
   0x4   :  { %376 = vmatprep.mubr.msk.f32.mxu0 %vm394_vm1, %v393_v0  ;;  %384 = vmatprep.subr.bf16.mxu0 %v395_v3  ;;  %v385_v6 = vpack.c.bf16 %v182_v5, %v181_v4  ;;  %v23_v7 = vld [vmem:[%s471_s0] sm:$0xff] }
   0x5   :  { %v342_v13 = vld [vmem:[%s472_s3] ss:$0 sm:$0xff] }
   0x6   :  { %386 = vmatpush3.bf16.msra.mxu0 %v385_v6  ;;  %v345_v20 = vld [vmem:[%s473_s5] ss:$0 sm:$0xff] }
   0x7   :  { %387 = vmatprep.subr.bf16.mxu0 %v395_v3 }
   0xa   :  { %389 = vmatpush3.bf16.msra.mxu0 %v388_v12 }
  0xd6   :  { %v96_v8 = vpop.f32.mrb[0].mxu0 }
  0xd7   :  { %v362_v9 = vpop.f32.mrb[1].mxu0  ;;  %364 = vmatpush3.msra.mxu1 %v96_v8 }
  0xd8   :  { %366 = vmatmul.mubr.msk.f32.vlgmr.msra.gmra.mrb[0].mxu1 %vm26_vm0, %v23_v7  ;;  %379 = vmatprep.subr.mxu1 %v393_v0 }
  0xd9   :  { %381 = vmatprep.mubr.msk.f32.mxu1 %vm394_vm1, %v393_v0 }
 0x1ab   :  { %v176_v14 = vpop.f32.mrb[0].mxu1 }
 0x1ac   :  { %v177_v15 = vadd.f32 %v342_v13, %v176_v14  ;;  %v367_v16 = vpop.f32.mrb[1].mxu1 }
 0x1ae   :  { %v180_v17 = vmax.f32 %v177_v15, 0.0 }
 0x1b0   :  { %377 = vmatmul.mubr.msk.f32.vlgmr.msra.gmra.mrb[2].mxu0 %vm185_vm2, %v180_v17 }
 0x283   :  { %v255_v18 = vpop.f32.mrb[2].mxu0 }
 0x284   :  { %v378_v19 = vpop.f32.mrb[3].mxu0  ;;  %380 = vmatpush3.msra.mxu1 %v255_v18 }
 0x285   :  { %382 = vmatmul.mubr.msk.f32.vlgmr.msra.gmra.mrb[2].mxu1 %vm26_vm0, %v23_v7 }
 0x358   :  { %v332_v21 = vpop.f32.mrb[2].mxu1 }
 0x359   :  { %v333_v22 = vadd.f32 %v345_v20, %v332_v21  ;;  %v383_v23 = vpop.f32.mrb[3].mxu1 }
 0x35b   :  { %336 = vst [vmem:[%s474_s6] sm:$0xff] %v333_v22 }

</bundles_post_ra>
